<compile_context>
chip_gen: v6e
topology: v6e:2x2x1
jax: 0.10.0
libtpu: 0.0.40
codegen_flags: <defaults>
</compile_context>

<pallas_src>
import functools
import math

import jax
import jax.numpy as jnp
import numpy as np
from jax.experimental import pallas as pl
from jax.experimental.pallas import tpu as pltpu

# Per-block byte cap: 2 MiB block -> <= 8 MiB pipelined (in + out, each
# double-buffered), safely inside every generation's default scoped VMEM.
_MAX_BLOCK_BYTES = 2 * 1024 * 1024


def _copy_kernel(x_ref, o_ref):
    # features (empty Sequential) == identity, classifier == identity:
    # the forward's only work is the flattened identity copy.
    o_ref[...] = x_ref[...]


def _pack_2d(n, d):
    """Pick a sublane/lane-dense 2-D packing (rows, cols) of the (n, d) buffer.

    Prefers rows % 8 == 0 and cols % 128 == 0 so vregs are fully utilized even
    for tiny batch sizes; otherwise falls back to (n, d) and relies on the
    full-array-block exception to the (8, 128) rule.
    """
    if n % 8 == 0 and d % 128 == 0:
        return n, d
    if d % 128 == 0:
        k = 8 // math.gcd(n, 8)  # smallest k making (n * k) % 8 == 0
        if d % k == 0 and (d // k) % 128 == 0:
            return n * k, d // k
    return n, d


def _choose_tile_rows(rows, cols, itemsize):
    """Largest multiple-of-8 row tile that divides `rows` and fits the byte cap."""
    if rows % 8 != 0 or cols % 128 != 0:
        return rows  # full-array block (exception to the (8,128) rule)
    cap = max(8, (_MAX_BLOCK_BYTES // (cols * itemsize)) // 8 * 8)
    tile = min(rows, cap)
    while rows % tile != 0:  # rows % 8 == 0, so this terminates at >= 8
        tile -= 8
    return tile


@functools.lru_cache(maxsize=None)
def _get_copy_fn(rows, cols, tile_rows, dtype):
    call = pl.pallas_call(
        _copy_kernel,
        out_shape=jax.ShapeDtypeStruct((rows, cols), dtype),
        grid=(rows // tile_rows,),
        in_specs=[pl.BlockSpec((tile_rows, cols), lambda i: (i, 0))],
        out_specs=pl.BlockSpec((tile_rows, cols), lambda i: (i, 0)),
        # Alias output onto the input HBM buffer: no second (rows, cols) array.
        input_output_aliases={0: 0},
        compiler_params=pltpu.CompilerParams(
            dimension_semantics=("parallel",),  # independent row tiles; lets
            # v7x shard the grid across its 2 TensorCores.
        ),
    )
    # Donate the (packed, kernel-private) input so the aliasing is effective
    # even when called eagerly; the caller's original x is never donated.
    return jax.jit(call, donate_argnums=(0,))


def lenet_forward(x):
    """Pallas implementation of LeNet.forward for the empty-Sequential module.

    x: (N, C, H, W), NCHW layout (matches PyTorch).
    returns: (N, C*H*W), identical values, row-major flatten
             (== torch's x.view(x.size(0), -1) on a contiguous tensor).
    """
    n = x.shape[0]
    d = int(np.prod(x.shape[1:]))

    # Layout glue only (metadata reshape); pick a vreg-friendly 2-D packing.
    rows, cols = _pack_2d(n, d)
    x2d = x.reshape(rows, cols)

    tile_rows = _choose_tile_rows(rows, cols, x.dtype.itemsize)
    out2d = _get_copy_fn(rows, cols, tile_rows, x.dtype)(x2d)

    # classifier (empty Sequential) == identity; reshape back to (N, D).
    return out2d.reshape(n, d)


def lenet_get_features(x):
    """Mirror of LeNet.get_features: returns (classifier(features), features).

    With empty Sequentials both outputs are the same flattened tensor.
    """
    flat = lenet_forward(x)
    return flat, flat


if __name__ == "__main__":
    # No parameters to initialize: both nn.Sequential() containers are empty.
    key = jax.random.PRNGKey(0)
    x = jax.random.normal(key, (2, 4, 16, 16), dtype=jnp.float32)  # NCHW

    # Reference (torch x.view(x.size(0), -1) semantics), captured on host
    # before the kernel runs since the kernel's packed input is donated.
    ref = np.asarray(jax.device_get(x)).reshape(2, -1)

    out = jax.block_until_ready(lenet_forward(x))
    assert out.shape == (2, 4 * 16 * 16), out.shape
    assert out.dtype == jnp.float32
    assert np.allclose(np.asarray(jax.device_get(out)), ref), "mismatch vs reference flatten"

    logits, feats = lenet_get_features(x)
    jax.block_until_ready((logits, feats))
    assert np.allclose(np.asarray(logits), ref) and np.allclose(np.asarray(feats), ref)

    print("KERNEL_OK")
</pallas_src>

<mosaic_0001>
module attributes {stable_mosaic.version = 11 : i64} {
  func.func @_copy_kernel(%arg0: i32, %arg1: memref<8x256xf32, #tpu.memory_space<vmem>>, %arg2: memref<8x256xf32, #tpu.memory_space<vmem>>) attributes {dimension_semantics = [#tpu.dimension_semantics<parallel>], iteration_bounds = array<i64: 1>, scalar_prefetch = 0 : i64, scratch_operands = 0 : i64, tpu.core_type = #tpu.core_type<tc>, window_params = [{transform_indices = @transform_0, window_bounds = array<i64: 8, 256>}, {transform_indices = @transform_1, window_bounds = array<i64: 8, 256>}]} {
    %c0 = arith.constant 0 : index
    %c0_0 = arith.constant 0 : index
    %0 = vector.load %arg1[%c0, %c0_0] : memref<8x256xf32, #tpu.memory_space<vmem>>, vector<8x256xf32>
    %c0_1 = arith.constant 0 : index
    %c0_2 = arith.constant 0 : index
    %1 = vector.load %arg2[%c0_1, %c0_2] : memref<8x256xf32, #tpu.memory_space<vmem>>, vector<8x256xf32>
    tpu.vector_store %arg2[%c0_1, %c0_2], %0 {strides = array<i32>} : memref<8x256xf32, #tpu.memory_space<vmem>>, vector<8x256xf32>,
    return
  }
  func.func @transform_0(%arg0: i32) -> (i32, i32) {
    %c0_i32 = arith.constant 0 : i32
    %c0_i32_0 = arith.constant 0 : i32
    return %arg0, %c0_i32 : i32, i32
  }
  func.func @transform_1(%arg0: i32) -> (i32, i32) {
    %c0_i32 = arith.constant 0 : i32
    %c0_i32_0 = arith.constant 0 : i32
    return %arg0, %c0_i32 : i32, i32
  }
}

</mosaic_0001>

<bundles_post_ra>
// kernel: tpu_custom_call.1
= control target key start
LH: loop header
LB: loop body
LE: loop exit
PB: predicated region body
PF: predicated region fallthrough
CT: control target
= control target key end

     0   :  { %6 = vsyncpa [#allocation3], 0  ;;  %s104_s0 = inlined_call_operand.hbm [shape: f32[8,256], index: 0, kind: input, shape index: {}, may-alias: {0,1}]   ;;  %s105_s1 = inlined_call_operand.hbm [shape: f32[8,256], index: 1, kind: output, shape index: {}, may-alias: {0,1}]  }
   0x1   :  { %7 = vsyncpa [#allocation4], 0  ;;  %s86_s6 = smov [#allocation2]  }
   0x2   :  { %s14_s7 = sshll.u32 %s86_s6, 4  ;;  %s15_s7 = int_to_ptr.vmem [resolvable:$true] %s14_s7 }
   0x3   :  { %s50_s8 = scalar_lea.vmem %s15_s7, 256  ;;  %p55_p1 = scmp.lt.s32.totalorder %s15_s7, %s15_s7 }
   0x4   :  { %p51_p0 = scmp.ne.s32.totalorder %s15_s7, %s50_s8  ;;  %p56_p2 = scmp.lt.s32.totalorder %s50_s8, %s50_s8 }
   0x6   :  { %p57_p3 = por %p56_p2, %p55_p1 }
   0x8   :  { %p58_p4 = pnand %p57_p3, %p51_p0 }
   0xa   :  { %61 = shalt.err (!%p58_p4)
}
   0xb   :  { %17 = dma.hbm_to_vmem [thread:$0]  %s104_s0, 256, %s15_s7, [#allocation3]  }
   0xc   :  { %82 = dma.done.wait [#allocation3], 256  }
   0xd   :  { %83 = vsyncadd [#allocation3], 4294967040  ;;  %s87_s11 = smov [#allocation5]   ;;  %v21_v0 = vld [vmem:[#allocation2] sm:$0xff]  ;;  %v22_v1 = vld [vmem:[#allocation2 + $0x8] sm:$0xff] }
   0xe   :  { %s31_s12 = sshll.u32 %s87_s11, 4  ;;  %23 = vst [vmem:[#allocation5] sm:$0xff] %v21_v0  ;;  %24 = vst [vmem:[#allocation5 + $0x8] sm:$0xff] %v22_v1  ;;  %s32_s12 = int_to_ptr.vmem [resolvable:$true] %s31_s12 }
   0xf   :  { %s62_s13 = scalar_lea.vmem %s32_s12, 256  ;;  %p67_p6 = scmp.lt.s32.totalorder %s32_s12, %s32_s12 }
  0x10   :  { %p63_p5 = scmp.ne.s32.totalorder %s32_s12, %s62_s13  ;;  %p68_p7 = scmp.lt.s32.totalorder %s62_s13, %s62_s13 }
  0x12   :  { %p69_p8 = por %p68_p7, %p67_p6 }
  0x14   :  { %p70_p9 = pnand %p69_p8, %p63_p5 }
  0x16   :  { %73 = shalt.err (!%p70_p9)
}
  0x17   :  { %34 = dma.vmem_to_hbm [thread:$0]  %s32_s12, 256, %s105_s1, [#allocation4]  }
  0x18   :  { %84 = dma.done.wait [#allocation4], 256  }
  0x19   :  { %85 = vsyncadd [#allocation4], 4294967040 }
  0x1a   :  { %38 = vsyncpa [#allocation3], 1 }
  0x1b   :  { %39 = vsyncpa [#allocation4], 1 }

</bundles_post_ra>
